<compile_context>
chip_gen: v6e
topology: v6e:2x2x1
jax: 0.10.0
libtpu: 0.0.40
codegen_flags: <defaults>
</compile_context>

<pallas_src>
import functools

import jax
import jax.numpy as jnp
from jax.experimental import pallas as pl
from jax.experimental.pallas import tpu as pltpu


_EPS = 1e-3
_LANES_TARGET = 16384   # flattened output pixels per grid step


# ----------------------------------------------------------------------------
# Pallas kernel: one (batch, output-row-tile) block of conv + BN + PReLU.
# ----------------------------------------------------------------------------
def _kernel(alpha_ref, w_ref, shift_ref, e_ref, o_ref, out_ref, *, wo, lanes):
    e = e_ref[0]                                   # (18, (TR+1)*Wo)  even rows, kw-expanded
    od = o_ref[0]                                  # (18, TR*Wo)      odd rows,  kw-expanded
    # kh = 0 / 1 / 2 taps.  The kh=2 tap is the kh=0 window shifted by one
    # output row, i.e. by Wo lanes of the flattened (rows*Wo) layout; the halo
    # row needed at the tile edge is already inside this block.
    acc = jnp.dot(w_ref[0], e[:, 0:lanes], preferred_element_type=jnp.float32)
    acc = acc + jnp.dot(w_ref[1], od, preferred_element_type=jnp.float32)
    acc = acc + jnp.dot(w_ref[2], e[:, wo:wo + lanes],
                        preferred_element_type=jnp.float32)
    y = acc + shift_ref[...]                       # conv bias + BN folded (f32)
    a = alpha_ref[0]                               # PReLU alpha (SMEM scalar)
    out_ref[0] = jnp.where(y >= 0.0, y, a * y)


def _pick_row_tile(ho, wo):
    """Output-row tile TR and tile count nt (cdiv grid; rows zero-padded)."""
    # Row-tiling keeps every block's lane extent a multiple of 128 only if
    # Wo % 128 == 0 (the even plane carries a 1-row halo, so both TR*Wo and
    # (TR+1)*Wo must be 128-aligned).  Otherwise use one whole image per step.
    if wo % 128 == 0:
        tr = max(1, min(ho, _LANES_TARGET // wo))
        nt = -(-ho // tr)
        return tr, nt
    return ho, 1


# ----------------------------------------------------------------------------
# Wrapper: NCHW in / NCHW out.  Only layout ops (pad / strided slice / concat /
# reshape) outside the kernel; all arithmetic happens inside the kernel.
# ----------------------------------------------------------------------------
@functools.partial(jax.jit, static_argnames=("compute_dtype",))
def enet_initial_block(x_nchw, p, compute_dtype=jnp.bfloat16):
    N, Cin, H, W = x_nchw.shape
    w = p["w"]                                    # (Cout, Cin, 3, 3)
    Cout = w.shape[0]
    Ho = (H - 1) // 2 + 1
    Wo = (W - 1) // 2 + 1
    TR, nt = _pick_row_tile(Ho, Wo)
    Ho_pad = TR * nt
    K = 3 * Cin                                   # channels per kh-plane (18)
    L = TR * Wo                                   # output lanes per grid step

    # ---- folded parameters (fold in f32, then cast operands) ----------------
    scale = p["g"] * jax.lax.rsqrt(p["v"] + _EPS)                      # (Cout,)
    shift2 = (p["be"] + (p["b"] - p["m"]) * scale).astype(jnp.float32).reshape(Cout, 1)
    wt = jnp.transpose(w, (2, 0, 3, 1)).reshape(3, Cout, K)            # (kh, Cout, kw*Cin)
    w3 = (wt * scale[None, :, None]).astype(compute_dtype)
    alpha = jnp.reshape(p["a"], (1,)).astype(jnp.float32)

    # ---- kw-expanded row-parity planes (the only tensors the kernel reads) --
    # In padded coords, tap (kh, kw) of output (ho, wo) = xq[2*ho + kh, 2*wo + kw].
    xq = jnp.pad(x_nchw.astype(compute_dtype),
                 ((0, 0), (0, 0), (1, 2 * Ho_pad - H), (1, 2 * Wo - W)))

    def kw_planes(row_start, n_rows):
        row_stop = row_start + 2 * (n_rows - 1) + 1
        taps = [xq[:, :, row_start:row_stop:2, kw:kw + 2 * Wo - 1:2]
                for kw in range(3)]                       # 3 x (N, Cin, n_rows, Wo)
        return jnp.concatenate(taps, axis=1)              # (N, 18, n_rows, Wo)

    even = kw_planes(0, Ho_pad + 1)                       # rows 0, 2, ..., 2*Ho_pad
    odd = kw_planes(1, Ho_pad)                            # rows 1, 3, ..., 2*Ho_pad-1

    # Even plane: per row-tile keep TR+1 rows (1-row halo) and flatten, so both
    # the kh=0 and kh=2 taps are contiguous lane windows of a single block.
    e_main = even[:, :, :Ho_pad, :].reshape(N, K, nt, TR, Wo)
    e_halo = even[:, :, TR::TR, :][:, :, :, None, :]      # (N, K, nt, 1, Wo)
    e_flat = jnp.concatenate([e_main, e_halo], axis=3).reshape(N, K, nt * (TR + 1) * Wo)
    o_flat = odd.reshape(N, K, nt * L)

    out = pl.pallas_call(
        functools.partial(_kernel, wo=Wo, lanes=L),
        out_shape=jax.ShapeDtypeStruct((N, Cout, nt * L), jnp.float32),
        grid=(N, nt),
        in_specs=[
            pl.BlockSpec(memory_space=pltpu.SMEM),                        # alpha
            pl.BlockSpec((3, Cout, K), lambda n, t: (0, 0, 0)),           # weights (BN folded)
            pl.BlockSpec((Cout, 1), lambda n, t: (0, 0)),                 # shift
            pl.BlockSpec((1, K, (TR + 1) * Wo), lambda n, t: (n, 0, t)),  # even plane
            pl.BlockSpec((1, K, L), lambda n, t: (n, 0, t)),              # odd plane
        ],
        out_specs=pl.BlockSpec((1, Cout, L), lambda n, t: (n, 0, t)),
        compiler_params=pltpu.CompilerParams(
            dimension_semantics=("parallel", "parallel"),
            vmem_limit_bytes=32 * 1024 * 1024),
    )(alpha, w3, shift2, e_flat, o_flat)

    # (N, Cout, Ho_pad*Wo) is already NCHW-flattened: reshape + crop, no transpose.
    return out.reshape(N, Cout, Ho_pad, Wo)[:, :, :Ho, :]


# ----------------------------------------------------------------------------
# Pure-JAX f32 reference (mirrors the PyTorch forward in eval mode).
# ----------------------------------------------------------------------------
def ref_forward(x, p):
    dn = ("NCHW", "OIHW", "NCHW")
    c = lambda a: a[None, :, None, None]
    y = jax.lax.conv_general_dilated(
        x, p["w"], window_strides=(2, 2), padding=[(1, 1), (1, 1)],
        dimension_numbers=dn, precision=jax.lax.Precision.HIGHEST)
    y = y + c(p["b"])
    y = (y - c(p["m"])) / jnp.sqrt(c(p["v"]) + _EPS) * c(p["g"]) + c(p["be"])
    return jnp.where(y >= 0.0, y, p["a"] * y)


# ----------------------------------------------------------------------------
# Deterministic parameter init (shapes from the module's __init__).
# ----------------------------------------------------------------------------
def init_params(key):
    Cin, Cout = 6, 32
    ks = jax.random.split(key, 6)
    nrm = lambda k, s, sc=0.2: sc * jax.random.normal(k, s, jnp.float32)
    pos = lambda k, s: jax.random.uniform(k, s, jnp.float32, 0.5, 1.5)
    return dict(
        w=nrm(ks[0], (Cout, Cin, 3, 3)),
        b=nrm(ks[1], (Cout,)),
        g=pos(ks[2], (Cout,)),
        be=nrm(ks[3], (Cout,)),
        m=nrm(ks[4], (Cout,)),
        v=pos(ks[5], (Cout,)),
        a=jnp.float32(0.25),        # nn.PReLU() default init
    )


if __name__ == "__main__":
    key = jax.random.PRNGKey(0)
    kp, kx = jax.random.split(key)
    N, Cin, H, W = 2, 6, 16, 16     # Cin=6 is fixed by the module

    params = init_params(kp)
    x = jax.random.normal(kx, (N, Cin, H, W), jnp.float32)

    out = jax.block_until_ready(enet_initial_block(x, params))
    ref = jax.block_until_ready(ref_forward(x, params))

    assert out.shape == ref.shape == (N, 32, H // 2, W // 2), (out.shape, ref.shape)
    # bf16 MXU operands (with BN scale folded into the weights in f32 before
    # the cast; f32 accumulation / epilogue) vs. the full-f32 reference.
    # Use compute_dtype=jnp.float32 for a tight-validation operand path.
    assert jnp.allclose(out, ref, atol=5e-2, rtol=5e-2), (
        f"max abs err {float(jnp.max(jnp.abs(out - ref)))}")

    print("KERNEL_OK")
</pallas_src>

<mosaic_0001>
module attributes {stable_mosaic.version = 11 : i64} {
  func.func @_kernel(%arg0: i32, %arg1: i32, %arg2: memref<1xf32, #tpu.memory_space<smem>>, %arg3: memref<3x32x18xbf16, #tpu.memory_space<vmem>>, %arg4: memref<32x1xf32, #tpu.memory_space<vmem>>, %arg5: memref<1x18x72xbf16, #tpu.memory_space<vmem>>, %arg6: memref<1x18x64xbf16, #tpu.memory_space<vmem>>, %arg7: memref<1x32x64xf32, #tpu.memory_space<vmem>>) attributes {dimension_semantics = [#tpu.dimension_semantics<parallel>, #tpu.dimension_semantics<parallel>], iteration_bounds = array<i64: 2, 1>, scalar_prefetch = 0 : i64, scratch_operands = 0 : i64, tpu.core_type = #tpu.core_type<tc>, window_params = [{transform_indices = @transform_0, window_bounds = array<i64: 1>}, {pipeline_mode = #tpu.pipeline_mode<synchronous>, transform_indices = @transform_1, window_bounds = array<i64: 3, 32, 18>}, {pipeline_mode = #tpu.pipeline_mode<synchronous>, transform_indices = @transform_2, window_bounds = array<i64: 32, 1>}, {transform_indices = @transform_3, window_bounds = array<i64: 1, 18, 72>}, {transform_indices = @transform_4, window_bounds = array<i64: 1, 18, 64>}, {transform_indices = @transform_5, window_bounds = array<i64: 1, 32, 64>}]} {
    %c0 = arith.constant 0 : index
    %c0_0 = arith.constant 0 : index
    %c0_1 = arith.constant 0 : index
    %0 = vector.load %arg5[%c0, %c0_0, %c0_1] : memref<1x18x72xbf16, #tpu.memory_space<vmem>>, vector<1x18x72xbf16>
    %1 = vector.shape_cast %0 : vector<1x18x72xbf16> to vector<18x72xbf16>
    %c0_2 = arith.constant 0 : index
    %c0_3 = arith.constant 0 : index
    %c0_4 = arith.constant 0 : index
    %2 = vector.load %arg6[%c0_2, %c0_3, %c0_4] : memref<1x18x64xbf16, #tpu.memory_space<vmem>>, vector<1x18x64xbf16>
    %3 = vector.shape_cast %2 : vector<1x18x64xbf16> to vector<18x64xbf16>
    %c0_5 = arith.constant 0 : index
    %c0_6 = arith.constant 0 : index
    %c0_7 = arith.constant 0 : index
    %4 = vector.load %arg3[%c0_5, %c0_6, %c0_7] : memref<3x32x18xbf16, #tpu.memory_space<vmem>>, vector<1x32x18xbf16>
    %5 = vector.shape_cast %4 : vector<1x32x18xbf16> to vector<32x18xbf16>
    %6 = vector.extract_strided_slice %1 {offsets = [0, 0], sizes = [18, 64], strides = [1, 1]} : vector<18x72xbf16> to vector<18x64xbf16>
    %cst = arith.constant dense<0.000000e+00> : vector<32x64xf32>
    %7 = tpu.matmul %5, %6, %cst {dimension_numbers = #tpu.dot_dimension_numbers<[1], [0], [0], [1], [0, 0, 1, 1], [], []>} : vector<32x18xbf16>, vector<18x64xbf16>, vector<32x64xf32> -> vector<32x64xf32>
    %c1 = arith.constant 1 : index
    %c0_8 = arith.constant 0 : index
    %c0_9 = arith.constant 0 : index
    %8 = vector.load %arg3[%c1, %c0_8, %c0_9] : memref<3x32x18xbf16, #tpu.memory_space<vmem>>, vector<1x32x18xbf16>
    %9 = vector.shape_cast %8 : vector<1x32x18xbf16> to vector<32x18xbf16>
    %cst_10 = arith.constant dense<0.000000e+00> : vector<32x64xf32>
    %10 = tpu.matmul %9, %3, %cst_10 {dimension_numbers = #tpu.dot_dimension_numbers<[1], [0], [0], [1], [0, 0, 1, 1], [], []>} : vector<32x18xbf16>, vector<18x64xbf16>, vector<32x64xf32> -> vector<32x64xf32>
    %11 = arith.addf %7, %10 : vector<32x64xf32>
    %c2 = arith.constant 2 : index
    %c0_11 = arith.constant 0 : index
    %c0_12 = arith.constant 0 : index
    %12 = vector.load %arg3[%c2, %c0_11, %c0_12] : memref<3x32x18xbf16, #tpu.memory_space<vmem>>, vector<1x32x18xbf16>
    %13 = vector.shape_cast %12 : vector<1x32x18xbf16> to vector<32x18xbf16>
    %14 = vector.extract_strided_slice %1 {offsets = [0, 8], sizes = [18, 64], strides = [1, 1]} : vector<18x72xbf16> to vector<18x64xbf16>
    %cst_13 = arith.constant dense<0.000000e+00> : vector<32x64xf32>
    %15 = tpu.matmul %13, %14, %cst_13 {dimension_numbers = #tpu.dot_dimension_numbers<[1], [0], [0], [1], [0, 0, 1, 1], [], []>} : vector<32x18xbf16>, vector<18x64xbf16>, vector<32x64xf32> -> vector<32x64xf32>
    %16 = arith.addf %11, %15 : vector<32x64xf32>
    %c0_14 = arith.constant 0 : index
    %c0_15 = arith.constant 0 : index
    %17 = vector.load %arg4[%c0_14, %c0_15] : memref<32x1xf32, #tpu.memory_space<vmem>>, vector<32x1xf32>
    %18 = vector.broadcast %17 : vector<32x1xf32> to vector<32x64xf32>
    %19 = arith.addf %16, %18 : vector<32x64xf32>
    %c0_16 = arith.constant 0 : index
    %20 = memref.load %arg2[%c0_16] : memref<1xf32, #tpu.memory_space<smem>>
    %cst_17 = arith.constant 0.000000e+00 : f32
    %21 = vector.broadcast %cst_17 : f32 to vector<32x64xf32>
    %22 = arith.cmpf oge, %19, %21 : vector<32x64xf32>
    %23 = vector.broadcast %20 : f32 to vector<32x64xf32>
    %24 = arith.mulf %23, %19 : vector<32x64xf32>
    %25 = arith.select %22, %19, %24 : vector<32x64xi1>, vector<32x64xf32>
    %c0_18 = arith.constant 0 : index
    %c0_19 = arith.constant 0 : index
    %c0_20 = arith.constant 0 : index
    %26 = vector.load %arg7[%c0_18, %c0_19, %c0_20] : memref<1x32x64xf32, #tpu.memory_space<vmem>>, vector<1x32x64xf32>
    %27 = vector.shape_cast %26 : vector<1x32x64xf32> to vector<32x64xf32>
    %28 = vector.shape_cast %25 : vector<32x64xf32> to vector<1x32x64xf32>
    tpu.vector_store %arg7[%c0_18, %c0_19, %c0_20], %28 {strides = array<i32>} : memref<1x32x64xf32, #tpu.memory_space<vmem>>, vector<1x32x64xf32>,
    return
  }
  func.func @transform_0(%arg0: i32, %arg1: i32) -> i32 {
    %c0_i32 = arith.constant 0 : i32
    %c0_i32_0 = arith.constant 0 : i32
    return %c0_i32 : i32
  }
  func.func @transform_1(%arg0: i32, %arg1: i32) -> (i32, i32, i32) {
    %c0_i32 = arith.constant 0 : i32
    %c0_i32_0 = arith.constant 0 : i32
    %c0_i32_1 = arith.constant 0 : i32
    %c0_i32_2 = arith.constant 0 : i32
    return %c0_i32, %c0_i32_0, %c0_i32_1 : i32, i32, i32
  }
  func.func @transform_2(%arg0: i32, %arg1: i32) -> (i32, i32) {
    %c0_i32 = arith.constant 0 : i32
    %c0_i32_0 = arith.constant 0 : i32
    %c0_i32_1 = arith.constant 0 : i32
    return %c0_i32, %c0_i32_0 : i32, i32
  }
  func.func @transform_3(%arg0: i32, %arg1: i32) -> (i32, i32, i32) {
    %c0_i32 = arith.constant 0 : i32
    %c0_i32_0 = arith.constant 0 : i32
    return %arg0, %c0_i32, %arg1 : i32, i32, i32
  }
  func.func @transform_4(%arg0: i32, %arg1: i32) -> (i32, i32, i32) {
    %c0_i32 = arith.constant 0 : i32
    %c0_i32_0 = arith.constant 0 : i32
    return %arg0, %c0_i32, %arg1 : i32, i32, i32
  }
  func.func @transform_5(%arg0: i32, %arg1: i32) -> (i32, i32, i32) {
    %c0_i32 = arith.constant 0 : i32
    %c0_i32_0 = arith.constant 0 : i32
    return %arg0, %c0_i32, %arg1 : i32, i32, i32
  }
}

</mosaic_0001>

<bundles_post_ra>
// kernel: enet_initial_block.1
= control target key start
LH: loop header
LB: loop body
LE: loop exit
PB: predicated region body
PF: predicated region fallthrough
CT: control target
= control target key end

     0   :  { %s863_s20 = smov 0   ;;  %s865_s21 = smov 0   ;;  %s949_s0 = inlined_call_operand.<no memory space> [shape: f32[1], index: 0, kind: input, shape index: {}]   ;;  %s950_s1 = inlined_call_operand.vmem [shape: bf16[3,32,18], index: 1, kind: input, shape index: {}]   ;;  %s951_s2 = inlined_call_operand.vmem [shape: f32[32,1], index: 2, kind: input, shape index: {}]   ;;  %s952_s3 = inlined_call_operand.vmem [shape: bf16[2,18,72], index: 3, kind: input, shape index: {}]   ;;  %s953_s4 = inlined_call_operand.vmem [shape: bf16[2,18,64], index: 4, kind: input, shape index: {}]   ;;  %s954_s5 = inlined_call_operand.vmem [shape: f32[2,32,64], index: 5, kind: output, shape index: {}]  }
   0x1   :  { %10 = sst [smem:[#allocation2]] %s949_s0  ;;  %s867_s22 = smov 0  }
   0x2 LB: > { %s28_s0 = sadd.s32 1, %s822_s21  ;;  %p694_p0 = scmp.ge.s32.totalorder %s826_s22, 1  ;;  %s826_s22 = sphi %s867_s22, %s16_s22   ;;  %s822_s21 = sphi %s865_s21, %s956_s21   ;;  %s818_s20 = sphi %s863_s20, %s955_s20  }
   0x3   : > { %p30_p1 = scmp.ge.s32.totalorder %s28_s0, 2  ;;  %p222_p2 = scmp.lt.s32.totalorder %s826_s22, 3 }
   0x5   : > { %s958_s0 = smov (%p30_p1, %s28_s0), 0  ;;  %p223_p3 = pnand %p694_p0, %p222_p2 }
   0x6   : > { %p264_p4 = scmp.lt.s32.totalorder (!%p223_p3), %s818_s20, 1  ;;  %s829_s13 = smov (!%p223_p3), 120  }
   0x7   : > { %226 = sbr.rel (%p223_p3) target bundleno = 348 (0x15c), region = 40  ;;  %s570_s29 = sld [smem:[#allocation2]] (!%p223_p3) }
   0xc   : > { %v798_v0 = vld [vmem:[%s950_s1 + $0x10] sm:$0xff]   ;;  %vm323_vm0 = vcmask 146432   ;;  %v799_v1 = vld [vmem:[%s950_s1] sm:$0xff]   ;;  %s960_s20 = smov (!%p264_p4, %s818_s20), 1  ;;  %vm330_vm1 = vcmask 1040384   ;;  %v828_v5 = vmov 0  }
   0xd   : > { %742 = vmatprep.mubr.msk.bf16.mxu0 %vm323_vm0, %v798_v0  ;;  %750 = vmatprep.mubr.msk.bf16.mxu1 %vm323_vm0, %v799_v1  ;;  %s765_s27 = smul.u32 12, %s960_s20  ;;  %v542_v2 = vld [vmem:[%s951_s2] sm:$0xff]  ;;  %v543_v6 = vld [vmem:[%s951_s2 + $0x8] sm:$0xff]  ;;  %v545_v12 = vld [vmem:[%s951_s2 + $0x18] sm:$0xff]  ;;  %v575_v35 = vstv %s570_s29  ;;  %vm584_vm2 = vcmask 523264  }
   0xe   : > { %792 = vset.pattern.permute.xlu1 %v828_v5  ;;  %793 = vset.pattern.permute.xlu0 %v828_v5  ;;  %v801_v11 = vld [vmem:[%s950_s1 + $0x8] sm:$0xff]   ;;  %v544_v13 = vld [vmem:[%s951_s2 + $0x10] sm:$0xff]  ;;  %v800_v14 = vld [vmem:[%s950_s1 + $0x18] sm:$0xff]  }
   0xf   : > { %s271_s30 = scalar_lea.vmem %s952_s3, %s765_s27  ;;  %s279_s8 = scalar_lea.vmem %s953_s4, %s765_s27  ;;  %548 = vperm.xlu1 %792, %v542_v2   ;;  %v802_v15 = vld [vmem:[%s950_s1 + $0x20] sm:$0xff]   ;;  %v803_v19 = vld [vmem:[%s950_s1 + $0x28] sm:$0xff]  }
  0x10   : > { %v794_v3 = vld [vmem:[%s271_s30 + $0x8] ss:$0 sps:$4 sm:$0x11]   ;;  %v795_v4 = vld [vmem:[%s271_s30] sm:$0xff]   ;;  %s725_s30 = sshll.u32 %s960_s20, 5 }
  0x11   : > { %477 = vrot.lane.b32.xlu0 %v794_v3, %s829_s13  ;;  %v796_v7 = vld [vmem:[%s279_s8 + $0x8] ss:$0 sps:$4 sm:$0x11]   ;;  %763 = vmatprep.subr.msk.bf16.mxu1 %vm330_vm1, %v794_v3  ;;  %v409_v8 = vsel %vm330_vm1, %v794_v3, 0  ;;  %v797_v9 = vld [vmem:[%s279_s8] sm:$0xff]   ;;  %s287_s8 = scalar_lea.vmem %s954_s5, %s725_s30 }
  0x12   : > { %747 = vmatpush3.bf16.msra.mxu1 %v409_v8  ;;  %762 = vmatprep.subr.msk.bf16.mxu0 %vm330_vm1, %v796_v7  ;;  %v332_v10 = vsel %vm330_vm1, %v796_v7, 0 }
  0x13   : > { %748 = vmatprep.subr.bf16.mxu1 %v795_v4  ;;  %739 = vmatpush3.bf16.msra.mxu0 %v332_v10 }
  0x14   : > { %553 = vperm.xlu1 %792, %v543_v6   ;;  %740 = vmatprep.subr.bf16.mxu0 %v797_v9 }
  0x15   : > { %475 = vrot.lane.b32.xlu0 %v795_v4, %s829_s13 }
  0x16   : > { %749 = vmatpush3.bf16.msra.mxu1 %v795_v4 }
  0x17   : > { %741 = vmatpush3.bf16.msra.mxu0 %v797_v9 }
  0x18   : > { %563 = vperm.xlu1 %792, %v545_v12  }
  0x19   : > { %751 = vmatmul.mubr.msk.bf16.vlgmr.msra.gmra.mxu1 %vm323_vm0, %v801_v11  ;;  %558 = vperm.xlu0 %793, %v544_v13  }
  0x1a   : > { %743 = vmatmul.mubr.msk.bf16.vlgmr.msra.gmra.mxu0 %vm323_vm0, %v800_v14 }
  0x1b   : > { %758 = vmatprep.mubr.msk.bf16.mxu0 %vm323_vm0, %v802_v15 }
  0x83   : > { %v478_v16 = vpop.permute.xlu0 %477 }
  0x84   : > { %v487_v17 = vsel %vm330_vm1, %v478_v16, 0  ;;  %764 = vmatprep.subr.msk.bf16.mxu0 %vm330_vm1, %v478_v16 }
  0x85   : > { %755 = vmatpush3.bf16.msra.mxu0 %v487_v17 }
  0x87   : > { %v476_v18 = vpop.permute.xlu0 %475 }
  0x88   : > { %756 = vmatprep.subr.bf16.mxu0 %v476_v18 }
  0x89   : > { %757 = vmatpush3.bf16.msra.mxu0 %v476_v18 }
  0x8a   : > { %v549_v23 = vpop.permute.xlu1 %548 }
  0x8c   : > { %759 = vmatmul.mubr.msk.bf16.vlgmr.msra.gmra.mxu0 %vm323_vm0, %v803_v19 }
  0x8f   : > { %v554_v29 = vpop.permute.xlu1 %553 }
  0x93   : > { %v564_v45 = vpop.permute.xlu1 %563 }
  0x94   : > { %v559_v31 = vpop.permute.xlu0 %558 }
  0xd9   : > { %v752_v22 = vpop.f32.mrf.mxu1 }
  0xda   : > { %v744_v20 = vpop.f32.mrf.mxu0 }
  0xdb   : > { %v445_v25 = vpop.f32.mrf.mxu1  ;;  %v454_v27 = vadd.f32 %v752_v22, %v744_v20 }
  0xdc   : > { %v368_v21 = vpop.f32.mrf.mxu0 }
  0xdd   : > { %v753_v28 = vpop.f32.mrf.mxu1  ;;  %v446_v32 = vadd.f32 %v445_v25, %v368_v21 }
  0xde   : > { %v745_v24 = vpop.f32.mrf.mxu0 }
  0xdf   : > { %v457_v36 = vadd.f32 %v753_v28, %v745_v24  ;;  %v448_v37 = vpop.f32.mrf.mxu1 }
  0xe0   : > { %v371_v26 = vpop.f32.mrf.mxu0 }
  0xe1   : > { %v449_v44 = vadd.f32 %v448_v37, %v371_v26 }
 0x14c   : > { %v760_v30 = vpop.f32.mrf.mxu0 }
 0x14d   : > { %v540_v33 = vadd.f32 %v760_v30, %v454_v27 }
 0x14e   : > { %v523_v34 = vpop.f32.mrf.mxu0 }
 0x14f   : > { %v538_v38 = vadd.f32 %v523_v34, %v446_v32  ;;  %v568_v39 = vadd.f32 %v559_v31, %v540_v33 }
 0x150   : > { %v761_v40 = vpop.f32.mrf.mxu0 }
 0x151   : > { %v566_v41 = vadd.f32 %v549_v23, %v538_v38  ;;  %vm573_vm3 = vcmp.ge.f32.partialorder %v568_v39, 0.0  ;;  %v578_v42 = vmul.f32 %v575_v35, %v568_v39  ;;  %v541_v43 = vadd.f32 %v761_v40, %v457_v36 }
 0x152   : > { %v526_v46 = vpop.f32.mrf.mxu0 }
 0x153   : > { %vm571_vm4 = vcmp.ge.f32.partialorder %v566_v41, 0.0  ;;  %v576_v47 = vmul.f32 %v575_v35, %v566_v41  ;;  %v582_v48 = vsel %vm573_vm3, %v568_v39, %v578_v42  ;;  %v569_v49 = vadd.f32 %v564_v45, %v541_v43 }
 0x154   : > { %587 = vst.msk [vmem:[%s287_s8 + $0x10] sm:$0xff] %vm584_vm2, %v582_v48  ;;  %v539_v50 = vadd.f32 %v526_v46, %v449_v44 }
 0x155   : > { %v580_v51 = vsel %vm571_vm4, %v566_v41, %v576_v47  ;;  %vm574_vm5 = vcmp.ge.f32.partialorder %v569_v49, 0.0  ;;  %v579_v52 = vmul.f32 %v575_v35, %v569_v49 }
 0x156   : > { %585 = vst.msk [vmem:[%s287_s8] sm:$0xff] %vm584_vm2, %v580_v51  ;;  %v567_v53 = vadd.f32 %v554_v29, %v539_v50 }
 0x157   : > { %v583_v54 = vsel %vm574_vm5, %v569_v49, %v579_v52 }
 0x158   : > { %588 = vst.msk [vmem:[%s287_s8 + $0x18] sm:$0xff] %vm584_vm2, %v583_v54  ;;  %vm572_vm6 = vcmp.ge.f32.partialorder %v567_v53, 0.0  ;;  %v577_v55 = vmul.f32 %v575_v35, %v567_v53 }
 0x15a   : > { %v581_v56 = vsel %vm572_vm6, %v567_v53, %v577_v55 }
 0x15b   : > { %586 = vst.msk [vmem:[%s287_s8 + $0x8] sm:$0xff] %vm584_vm2, %v581_v56 }
 0x15c PF: > { %s16_s22 = sadd.s32 1, %s826_s22   ;;  %s955_s20 = smov %s822_s21 }
 0x15d   : > { %p13_p5 = scmp.ge.s32.totalorder %s16_s22, 4   ;;  %s956_s21 = smov %s958_s0 }
 0x15f   :  { %15 = sbr.rel (!%p13_p5) target bundleno = 2 (0x2), region = 75 }

</bundles_post_ra>
